<compile_context>
chip_gen: v5e
topology: v5e:2x2
jax: 0.10.0
libtpu: 0.0.40
codegen_flags: <defaults>
</compile_context>

<pallas_src>
import jax
import jax.numpy as jnp
from jax.experimental import pallas as pl
from jax.experimental.pallas import tpu as pltpu

# ----------------------- model hyper-parameters (small) -----------------------
B = 2            # batch
BP = 8           # batch padded to one sublane tile
IMG_H = IMG_W = 16
HW = IMG_H * IMG_W
C_OUT = 8        # conv channels
V_DIM = 32       # maml visual feature dim (args.feat_dim)
VOCAB = 50
SEQ = 8          # question length
EMB_DIM = 32     # word embedding dim
NUM_HID = 32     # GRU hidden
ATT_DIM = 32     # SAN attention dim
NUM_STACKS = 2   # SAN attention stacks
NUM_OBJS = 1     # unsqueeze(1) -> one visual "object"

# static row offsets inside the packed 32-lane weight slab
OFF_WQ = 0
OFF_WV = OFF_WQ + NUM_HID           # 32
OFF_FCW = OFF_WV + V_DIM            # 64
OFF_FCB = OFF_FCW + C_OUT           # 72
OFF_BQ = OFF_FCB + 1                # 73
WSLAB_ROWS = OFF_BQ + 1             # 74


class Args:
    maml = True
    maml_nums = (4,)        # len == 1  -> single maml_v_emb module
    autoencoder = False
    feat_dim = V_DIM


# ------------------------------- fused Pallas kernel ---------------------------
def san_fused_kernel(patches_ref, convw_ref, xg_ref, gru_ref, wslab_ref, o_ref):
    f32 = jnp.float32

    # ---- maml_v_emb: 3x3 conv (bias folded into an augmented ones patch-row)
    #      -> ReLU -> global average pool (lane reduction) -> FC -> ReLU
    patches = patches_ref[...]                                        # (B, 10, HW)  HW on lanes
    wc = jnp.broadcast_to(convw_ref[...], (B,) + convw_ref.shape)     # (B, C_OUT, 10)
    y = jnp.einsum('bcp,bph->bch', wc, patches,
                   preferred_element_type=f32)                        # (B, C_OUT, HW)
    y = jnp.maximum(y, 0.0)
    pooled = jnp.sum(y, axis=2) * (1.0 / HW)                          # (B, C_OUT)
    pooled = jnp.concatenate(
        [pooled, jnp.zeros((BP - B, C_OUT), f32)], axis=0)            # (BP, C_OUT) 8-row aligned
    fcw = wslab_ref[OFF_FCW:OFF_FCW + C_OUT, :]                       # (C_OUT, V_DIM)
    fcb = wslab_ref[OFF_FCB:OFF_FCB + 1, :]                           # (1, V_DIM)
    v_feat = jnp.maximum(
        jnp.dot(pooled, fcw, preferred_element_type=f32) + fcb, 0.0)  # (BP, V_DIM)

    # ---- q_emb: single-layer GRU over T steps (PyTorch gate order [r|z|n]),
    #      batch padded to 8 sublanes; returns last hidden state.
    wx3 = gru_ref[0:EMB_DIM, :]                                       # (E, 3H)
    wh3 = gru_ref[EMB_DIM:EMB_DIM + NUM_HID, :]                       # (H, 3H)
    bx = gru_ref[EMB_DIM + NUM_HID:EMB_DIM + NUM_HID + 1, :]          # (1, 3H)
    bh = gru_ref[EMB_DIM + NUM_HID + 1:EMB_DIM + NUM_HID + 2, :]      # (1, 3H)

    # hoisted input projection for all time steps, gate slices taken once
    gi = jnp.dot(xg_ref[...], wx3, preferred_element_type=f32) + bx   # (T*BP, 3H)
    H = NUM_HID
    gi_r = gi[:, 0:H]
    gi_z = gi[:, H:2 * H]
    gi_n = gi[:, 2 * H:3 * H]

    h = jnp.zeros((BP, H), f32)
    for t in range(SEQ):   # static unroll: T=8 fixed
        lo = t * BP        # sublane-aligned slice start
        if t == 0:
            gh = jnp.broadcast_to(bh, (BP, 3 * H))                    # h == 0: skip matmul
        else:
            gh = jnp.dot(h, wh3, preferred_element_type=f32) + bh     # one fused (8,32)@(32,96)
        r = jax.nn.sigmoid(gi_r[lo:lo + BP, :] + gh[:, 0:H])
        z = jax.nn.sigmoid(gi_z[lo:lo + BP, :] + gh[:, H:2 * H])
        n = jnp.tanh(gi_n[lo:lo + BP, :] + r * gh[:, 2 * H:3 * H])    # b_hn inside r*(.)
        h = (1.0 - z) * n + z * h
    q_emb = h                                                         # (BP, NUM_HID)

    # ---- v_att: NUM_STACKS-stack SAN over the single visual object (K = 1).
    # With K=1 the per-stack softmax over objects is identically 1, so each stack
    # adds exactly its own image projection; wv here is the glue-side sum of the
    # per-stack projections, and the logit / inter-stack question layers cancel.
    wq = wslab_ref[OFF_WQ:OFF_WQ + NUM_HID, :]                        # (H, A)
    wv = wslab_ref[OFF_WV:OFF_WV + V_DIM, :]                          # (V, A)
    bq = wslab_ref[OFF_BQ:OFF_BQ + 1, :]                              # (1, A)
    u = (jnp.dot(q_emb, wq, preferred_element_type=f32) + bq
         + jnp.dot(v_feat, wv, preferred_element_type=f32))           # (BP, A)
    o_ref[...] = u                                                    # full-tile store


# ------------------------------ pallas_call glue -------------------------------
def _full_spec(arr):
    nd = arr.ndim
    return pl.BlockSpec(arr.shape, lambda i, _n=nd: (0,) * _n)


def im2col_3x3(imgs):
    """imgs: [B, 1, H, W] NCHW, 'same' zero padding -> patches [B, 9, H*W]."""
    b, _, h, w = imgs.shape
    xpad = jnp.pad(imgs, ((0, 0), (0, 0), (1, 1), (1, 1)))
    cols = []
    for di in range(3):
        for dj in range(3):
            cols.append(xpad[:, 0, di:di + h, dj:dj + w].reshape(b, h * w))
    return jnp.stack(cols, axis=1)                                    # (B, 9, HW)


@jax.jit
def san_forward(params, images, q_ids):
    p = params
    bsz = images.shape[0]
    hw = images.shape[2] * images.shape[3]

    # conv inputs: HW on the lane axis; conv bias folded as a constant ones row
    patches = im2col_3x3(images)                                      # (B, 9, HW)
    patches_aug = jnp.concatenate(
        [patches, jnp.ones((bsz, 1, hw), jnp.float32)], axis=1)       # (B, 10, HW)
    convw_aug = jnp.concatenate([p["conv_w"], p["conv_b"]], axis=1)   # (C_OUT, 10)

    # GRU inputs: embedding gather, batch padded to 8 sublanes, time-major layout
    w_emb = jnp.take(p["emb_table"], q_ids, axis=0)                   # (B, T, E)
    w_emb = jnp.pad(w_emb, ((0, BP - bsz), (0, 0), (0, 0)))           # (BP, T, E)
    xg = jnp.transpose(w_emb, (1, 0, 2)).reshape(SEQ * BP, EMB_DIM)   # (T*BP, E)

    # parameter slabs: a handful of DMAs instead of ~20
    gru_slab = jnp.concatenate(
        [p["gru_wx"], p["gru_wh"], p["gru_bx"], p["gru_bh"]], axis=0)     # (66, 3H)
    wv_tot = jnp.sum(p["att_wv"], axis=0)                                 # (V, A): per-stack sum
    wslab = jnp.concatenate(
        [p["att_wq"], wv_tot, p["fc_w"], p["fc_b"], p["att_bq"]], axis=0)  # (74, 32)

    inputs = (patches_aug, convw_aug, xg, gru_slab, wslab)

    out = pl.pallas_call(
        san_fused_kernel,
        out_shape=jax.ShapeDtypeStruct((BP, ATT_DIM), jnp.float32),
        grid=(1,),
        in_specs=[_full_spec(a) for a in inputs],
        out_specs=pl.BlockSpec((BP, ATT_DIM), lambda i: (0, 0)),
        compiler_params=pltpu.CompilerParams(
            dimension_semantics=("arbitrary",)),
    )(*inputs)
    return out[:bsz]                                                  # drop padded rows


# --------------------------------- the model -----------------------------------
class SANModelPallas:
    def __init__(self, params, args):
        self.params = params
        self.args = args

    def forward(self, v, q):
        """v: list, v[0] = images [B, 1, H, W];  q: int32 [B, T]. Returns att [B, ATT_DIM]."""
        assert self.args.maml and not self.args.autoencoder
        # TODO(synk): autoencoder branch and classifier/classify() not exercised here.
        return san_forward(self.params, v[0], q)


# ------------------------------ parameter init ----------------------------------
def init_params(key):
    ks = jax.random.split(key, 8)

    def nrm(k, shape, scale=0.1):
        return (scale * jax.random.normal(k, shape)).astype(jnp.float32)

    return dict(
        conv_w=nrm(ks[0], (C_OUT, 9)),
        conv_b=jnp.zeros((C_OUT, 1), jnp.float32),
        fc_w=nrm(ks[1], (C_OUT, V_DIM)),
        fc_b=jnp.zeros((1, V_DIM), jnp.float32),
        emb_table=nrm(ks[2], (VOCAB, EMB_DIM)),
        gru_wx=nrm(ks[3], (EMB_DIM, 3 * NUM_HID)),     # [r|z|n] packing (PyTorch order)
        gru_wh=nrm(ks[4], (NUM_HID, 3 * NUM_HID)),
        gru_bx=jnp.zeros((1, 3 * NUM_HID), jnp.float32),
        gru_bh=jnp.zeros((1, 3 * NUM_HID), jnp.float32),
        att_wq=nrm(ks[5], (NUM_HID, ATT_DIM)),
        att_bq=jnp.zeros((1, ATT_DIM), jnp.float32),
        att_wv=nrm(ks[6], (NUM_STACKS, V_DIM, ATT_DIM)),  # per-stack image projections
        # Attention-logit layers (fc13 / layers[3s+2]) and the inter-stack question
        # re-projections only feed the object softmax, which is identically 1 for
        # NUM_OBJS=1, so they cancel; kept only for parameter parity.
        att_wa=nrm(ks[7], (ATT_DIM, NUM_STACKS)),
        att_ba=jnp.zeros((1, NUM_STACKS), jnp.float32),
    )


if __name__ == "__main__":
    key = jax.random.PRNGKey(0)
    kp, kv, kq = jax.random.split(key, 3)

    params = init_params(kp)
    images = jax.random.normal(kv, (B, 1, IMG_H, IMG_W), jnp.float32)   # v[0]
    q_ids = jax.random.randint(kq, (B, SEQ), 0, VOCAB, dtype=jnp.int32)

    model = SANModelPallas(params, Args())
    att = model.forward([images], q_ids)
    att = jax.block_until_ready(att)

    assert att.shape == (B, ATT_DIM)
    assert bool(jnp.all(jnp.isfinite(att)))
    print("KERNEL_OK")
</pallas_src>

<mosaic_0001>
module attributes {stable_mosaic.version = 11 : i64} {
  func.func @san_fused_kernel(%arg0: i32, %arg1: memref<2x10x256xf32, #tpu.memory_space<vmem>>, %arg2: memref<8x10xf32, #tpu.memory_space<vmem>>, %arg3: memref<64x32xf32, #tpu.memory_space<vmem>>, %arg4: memref<66x96xf32, #tpu.memory_space<vmem>>, %arg5: memref<74x32xf32, #tpu.memory_space<vmem>>, %arg6: memref<8x32xf32, #tpu.memory_space<vmem>>) attributes {dimension_semantics = [#tpu.dimension_semantics<arbitrary>], iteration_bounds = array<i64: 1>, scalar_prefetch = 0 : i64, scratch_operands = 0 : i64, tpu.core_type = #tpu.core_type<tc>, window_params = [{pipeline_mode = #tpu.pipeline_mode<synchronous>, transform_indices = @transform_0, window_bounds = array<i64: 2, 10, 256>}, {pipeline_mode = #tpu.pipeline_mode<synchronous>, transform_indices = @transform_1, window_bounds = array<i64: 8, 10>}, {pipeline_mode = #tpu.pipeline_mode<synchronous>, transform_indices = @transform_2, window_bounds = array<i64: 64, 32>}, {pipeline_mode = #tpu.pipeline_mode<synchronous>, transform_indices = @transform_3, window_bounds = array<i64: 66, 96>}, {pipeline_mode = #tpu.pipeline_mode<synchronous>, transform_indices = @transform_4, window_bounds = array<i64: 74, 32>}, {pipeline_mode = #tpu.pipeline_mode<synchronous>, transform_indices = @transform_5, window_bounds = array<i64: 8, 32>}]} {
    %c0 = arith.constant 0 : index
    %c0_0 = arith.constant 0 : index
    %c0_1 = arith.constant 0 : index
    %0 = vector.load %arg1[%c0, %c0_0, %c0_1] : memref<2x10x256xf32, #tpu.memory_space<vmem>>, vector<2x10x256xf32>
    %c0_2 = arith.constant 0 : index
    %c0_3 = arith.constant 0 : index
    %1 = vector.load %arg2[%c0_2, %c0_3] : memref<8x10xf32, #tpu.memory_space<vmem>>, vector<8x10xf32>
    %2 = vector.shape_cast %1 : vector<8x10xf32> to vector<1x8x10xf32>
    %3 = vector.broadcast %2 : vector<1x8x10xf32> to vector<2x8x10xf32>
    "tpu.trace_start"() <{level = 10 : i32, message = "bcp,bph->bch"}> : () -> ()
    %cst = arith.constant dense<0.000000e+00> : vector<2x8x256xf32>
    %4 = tpu.matmul %3, %0, %cst {dimension_numbers = #tpu.dot_dimension_numbers<[2], [1], [1], [2], [0, 0, 0, 1, 1, 2], [0], [0]>} : vector<2x8x10xf32>, vector<2x10x256xf32>, vector<2x8x256xf32> -> vector<2x8x256xf32>
    "tpu.trace_stop"() : () -> ()
    %cst_4 = arith.constant 0.000000e+00 : f32
    %5 = vector.broadcast %cst_4 : f32 to vector<2x8x256xf32>
    %6 = arith.maximumf %4, %5 : vector<2x8x256xf32>
    %cst_5 = arith.constant dense<0.000000e+00> : vector<2x8xf32>
    %7 = vector.multi_reduction <add>, %6, %cst_5 [2] : vector<2x8x256xf32> to vector<2x8xf32>
    %cst_6 = arith.constant 3.906250e-03 : f32
    %8 = vector.broadcast %cst_6 : f32 to vector<2x8xf32>
    %9 = arith.mulf %7, %8 : vector<2x8xf32>
    %cst_7 = arith.constant 0.000000e+00 : f32
    %10 = vector.broadcast %cst_7 : f32 to vector<6x8xf32>
    %11 = tpu.concatenate %9, %10 in 0 : vector<2x8xf32>, vector<6x8xf32> -> vector<8x8xf32>
    %c64 = arith.constant 64 : index
    %c0_8 = arith.constant 0 : index
    %12 = vector.load %arg5[%c64, %c0_8] : memref<74x32xf32, #tpu.memory_space<vmem>>, vector<8x32xf32>
    %c72 = arith.constant 72 : index
    %c0_9 = arith.constant 0 : index
    %13 = vector.load %arg5[%c72, %c0_9] : memref<74x32xf32, #tpu.memory_space<vmem>>, vector<1x32xf32>
    %cst_10 = arith.constant dense<0.000000e+00> : vector<8x32xf32>
    %14 = tpu.matmul %11, %12, %cst_10 {dimension_numbers = #tpu.dot_dimension_numbers<[1], [0], [0], [1], [0, 0, 1, 1], [], []>} : vector<8x8xf32>, vector<8x32xf32>, vector<8x32xf32> -> vector<8x32xf32>
    %15 = vector.broadcast %13 : vector<1x32xf32> to vector<8x32xf32>
    %16 = arith.addf %14, %15 : vector<8x32xf32>
    %cst_11 = arith.constant 0.000000e+00 : f32
    %17 = vector.broadcast %cst_11 : f32 to vector<8x32xf32>
    %18 = arith.maximumf %16, %17 : vector<8x32xf32>
    %c0_12 = arith.constant 0 : index
    %c0_13 = arith.constant 0 : index
    %19 = vector.load %arg4[%c0_12, %c0_13] : memref<66x96xf32, #tpu.memory_space<vmem>>, vector<32x96xf32>
    %c32 = arith.constant 32 : index
    %c0_14 = arith.constant 0 : index
    %20 = vector.load %arg4[%c32, %c0_14] : memref<66x96xf32, #tpu.memory_space<vmem>>, vector<32x96xf32>
    %c64_15 = arith.constant 64 : index
    %c0_16 = arith.constant 0 : index
    %21 = vector.load %arg4[%c64_15, %c0_16] : memref<66x96xf32, #tpu.memory_space<vmem>>, vector<1x96xf32>
    %c65 = arith.constant 65 : index
    %c0_17 = arith.constant 0 : index
    %22 = vector.load %arg4[%c65, %c0_17] : memref<66x96xf32, #tpu.memory_space<vmem>>, vector<1x96xf32>
    %c0_18 = arith.constant 0 : index
    %c0_19 = arith.constant 0 : index
    %23 = vector.load %arg3[%c0_18, %c0_19] : memref<64x32xf32, #tpu.memory_space<vmem>>, vector<64x32xf32>
    %cst_20 = arith.constant dense<0.000000e+00> : vector<64x96xf32>
    %24 = tpu.matmul %23, %19, %cst_20 {dimension_numbers = #tpu.dot_dimension_numbers<[1], [0], [0], [1], [0, 0, 1, 1], [], []>} : vector<64x32xf32>, vector<32x96xf32>, vector<64x96xf32> -> vector<64x96xf32>
    %25 = vector.broadcast %21 : vector<1x96xf32> to vector<64x96xf32>
    %26 = arith.addf %24, %25 : vector<64x96xf32>
    %27 = vector.extract_strided_slice %26 {offsets = [0, 0], sizes = [64, 32], strides = [1, 1]} : vector<64x96xf32> to vector<64x32xf32>
    %28 = vector.extract_strided_slice %26 {offsets = [0, 32], sizes = [64, 32], strides = [1, 1]} : vector<64x96xf32> to vector<64x32xf32>
    %29 = vector.extract_strided_slice %26 {offsets = [0, 64], sizes = [64, 32], strides = [1, 1]} : vector<64x96xf32> to vector<64x32xf32>
    %cst_21 = arith.constant 0.000000e+00 : f32
    %30 = vector.broadcast %cst_21 : f32 to vector<8x32xf32>
    %31 = vector.shape_cast %22 : vector<1x96xf32> to vector<1x96xf32>
    %32 = vector.broadcast %31 : vector<1x96xf32> to vector<8x96xf32>
    %33 = vector.extract_strided_slice %27 {offsets = [0, 0], sizes = [8, 32], strides = [1, 1]} : vector<64x32xf32> to vector<8x32xf32>
    %34 = vector.extract_strided_slice %32 {offsets = [0, 0], sizes = [8, 32], strides = [1, 1]} : vector<8x96xf32> to vector<8x32xf32>
    %35 = arith.addf %33, %34 : vector<8x32xf32>
    %36 = arith.negf %35 : vector<8x32xf32>
    %37 = math.exp %36 : vector<8x32xf32>
    %cst_22 = arith.constant 1.000000e+00 : f32
    %38 = vector.broadcast %cst_22 : f32 to vector<8x32xf32>
    %39 = arith.addf %38, %37 : vector<8x32xf32>
    %40 = arith.divf %38, %39 : vector<8x32xf32>
    %41 = vector.extract_strided_slice %28 {offsets = [0, 0], sizes = [8, 32], strides = [1, 1]} : vector<64x32xf32> to vector<8x32xf32>
    %42 = vector.extract_strided_slice %32 {offsets = [0, 32], sizes = [8, 32], strides = [1, 1]} : vector<8x96xf32> to vector<8x32xf32>
    %43 = arith.addf %41, %42 : vector<8x32xf32>
    %44 = arith.negf %43 : vector<8x32xf32>
    %45 = math.exp %44 : vector<8x32xf32>
    %cst_23 = arith.constant 1.000000e+00 : f32
    %46 = vector.broadcast %cst_23 : f32 to vector<8x32xf32>
    %47 = arith.addf %46, %45 : vector<8x32xf32>
    %48 = arith.divf %46, %47 : vector<8x32xf32>
    %49 = vector.extract_strided_slice %29 {offsets = [0, 0], sizes = [8, 32], strides = [1, 1]} : vector<64x32xf32> to vector<8x32xf32>
    %50 = vector.extract_strided_slice %32 {offsets = [0, 64], sizes = [8, 32], strides = [1, 1]} : vector<8x96xf32> to vector<8x32xf32>
    %51 = arith.mulf %40, %50 : vector<8x32xf32>
    %52 = arith.addf %49, %51 : vector<8x32xf32>
    %53 = math.tanh %52 : vector<8x32xf32>
    %cst_24 = arith.constant 1.000000e+00 : f32
    %54 = vector.broadcast %cst_24 : f32 to vector<8x32xf32>
    %55 = arith.subf %54, %48 : vector<8x32xf32>
    %56 = arith.mulf %55, %53 : vector<8x32xf32>
    %57 = arith.mulf %48, %30 : vector<8x32xf32>
    %58 = arith.addf %56, %57 : vector<8x32xf32>
    %cst_25 = arith.constant dense<0.000000e+00> : vector<8x96xf32>
    %59 = tpu.matmul %58, %20, %cst_25 {dimension_numbers = #tpu.dot_dimension_numbers<[1], [0], [0], [1], [0, 0, 1, 1], [], []>} : vector<8x32xf32>, vector<32x96xf32>, vector<8x96xf32> -> vector<8x96xf32>
    %60 = vector.broadcast %22 : vector<1x96xf32> to vector<8x96xf32>
    %61 = arith.addf %59, %60 : vector<8x96xf32>
    %62 = vector.extract_strided_slice %27 {offsets = [8, 0], sizes = [8, 32], strides = [1, 1]} : vector<64x32xf32> to vector<8x32xf32>
    %63 = vector.extract_strided_slice %61 {offsets = [0, 0], sizes = [8, 32], strides = [1, 1]} : vector<8x96xf32> to vector<8x32xf32>
    %64 = arith.addf %62, %63 : vector<8x32xf32>
    %65 = arith.negf %64 : vector<8x32xf32>
    %66 = math.exp %65 : vector<8x32xf32>
    %cst_26 = arith.constant 1.000000e+00 : f32
    %67 = vector.broadcast %cst_26 : f32 to vector<8x32xf32>
    %68 = arith.addf %67, %66 : vector<8x32xf32>
    %69 = arith.divf %67, %68 : vector<8x32xf32>
    %70 = vector.extract_strided_slice %28 {offsets = [8, 0], sizes = [8, 32], strides = [1, 1]} : vector<64x32xf32> to vector<8x32xf32>
    %71 = vector.extract_strided_slice %61 {offsets = [0, 32], sizes = [8, 32], strides = [1, 1]} : vector<8x96xf32> to vector<8x32xf32>
    %72 = arith.addf %70, %71 : vector<8x32xf32>
    %73 = arith.negf %72 : vector<8x32xf32>
    %74 = math.exp %73 : vector<8x32xf32>
    %cst_27 = arith.constant 1.000000e+00 : f32
    %75 = vector.broadcast %cst_27 : f32 to vector<8x32xf32>
    %76 = arith.addf %75, %74 : vector<8x32xf32>
    %77 = arith.divf %75, %76 : vector<8x32xf32>
    %78 = vector.extract_strided_slice %29 {offsets = [8, 0], sizes = [8, 32], strides = [1, 1]} : vector<64x32xf32> to vector<8x32xf32>
    %79 = vector.extract_strided_slice %61 {offsets = [0, 64], sizes = [8, 32], strides = [1, 1]} : vector<8x96xf32> to vector<8x32xf32>
    %80 = arith.mulf %69, %79 : vector<8x32xf32>
    %81 = arith.addf %78, %80 : vector<8x32xf32>
    %82 = math.tanh %81 : vector<8x32xf32>
    %cst_28 = arith.constant 1.000000e+00 : f32
    %83 = vector.broadcast %cst_28 : f32 to vector<8x32xf32>
    %84 = arith.subf %83, %77 : vector<8x32xf32>
    %85 = arith.mulf %84, %82 : vector<8x32xf32>
    %86 = arith.mulf %77, %58 : vector<8x32xf32>
    %87 = arith.addf %85, %86 : vector<8x32xf32>
    %cst_29 = arith.constant dense<0.000000e+00> : vector<8x96xf32>
    %88 = tpu.matmul %87, %20, %cst_29 {dimension_numbers = #tpu.dot_dimension_numbers<[1], [0], [0], [1], [0, 0, 1, 1], [], []>} : vector<8x32xf32>, vector<32x96xf32>, vector<8x96xf32> -> vector<8x96xf32>
    %89 = vector.broadcast %22 : vector<1x96xf32> to vector<8x96xf32>
    %90 = arith.addf %88, %89 : vector<8x96xf32>
    %91 = vector.extract_strided_slice %27 {offsets = [16, 0], sizes = [8, 32], strides = [1, 1]} : vector<64x32xf32> to vector<8x32xf32>
    %92 = vector.extract_strided_slice %90 {offsets = [0, 0], sizes = [8, 32], strides = [1, 1]} : vector<8x96xf32> to vector<8x32xf32>
    %93 = arith.addf %91, %92 : vector<8x32xf32>
    %94 = arith.negf %93 : vector<8x32xf32>
    %95 = math.exp %94 : vector<8x32xf32>
    %cst_30 = arith.constant 1.000000e+00 : f32
    %96 = vector.broadcast %cst_30 : f32 to vector<8x32xf32>
    %97 = arith.addf %96, %95 : vector<8x32xf32>
    %98 = arith.divf %96, %97 : vector<8x32xf32>
    %99 = vector.extract_strided_slice %28 {offsets = [16, 0], sizes = [8, 32], strides = [1, 1]} : vector<64x32xf32> to vector<8x32xf32>
    %100 = vector.extract_strided_slice %90 {offsets = [0, 32], sizes = [8, 32], strides = [1, 1]} : vector<8x96xf32> to vector<8x32xf32>
    %101 = arith.addf %99, %100 : vector<8x32xf32>
    %102 = arith.negf %101 : vector<8x32xf32>
    %103 = math.exp %102 : vector<8x32xf32>
    %cst_31 = arith.constant 1.000000e+00 : f32
    %104 = vector.broadcast %cst_31 : f32 to vector<8x32xf32>
    %105 = arith.addf %104, %103 : vector<8x32xf32>
    %106 = arith.divf %104, %105 : vector<8x32xf32>
    %107 = vector.extract_strided_slice %29 {offsets = [16, 0], sizes = [8, 32], strides = [1, 1]} : vector<64x32xf32> to vector<8x32xf32>
    %108 = vector.extract_strided_slice %90 {offsets = [0, 64], sizes = [8, 32], strides = [1, 1]} : vector<8x96xf32> to vector<8x32xf32>
    %109 = arith.mulf %98, %108 : vector<8x32xf32>
    %110 = arith.addf %107, %109 : vector<8x32xf32>
    %111 = math.tanh %110 : vector<8x32xf32>
    %cst_32 = arith.constant 1.000000e+00 : f32
    %112 = vector.broadcast %cst_32 : f32 to vector<8x32xf32>
    %113 = arith.subf %112, %106 : vector<8x32xf32>
    %114 = arith.mulf %113, %111 : vector<8x32xf32>
    %115 = arith.mulf %106, %87 : vector<8x32xf32>
    %116 = arith.addf %114, %115 : vector<8x32xf32>
    %cst_33 = arith.constant dense<0.000000e+00> : vector<8x96xf32>
    %117 = tpu.matmul %116, %20, %cst_33 {dimension_numbers = #tpu.dot_dimension_numbers<[1], [0], [0], [1], [0, 0, 1, 1], [], []>} : vector<8x32xf32>, vector<32x96xf32>, vector<8x96xf32> -> vector<8x96xf32>
    %118 = vector.broadcast %22 : vector<1x96xf32> to vector<8x96xf32>
    %119 = arith.addf %117, %118 : vector<8x96xf32>
    %120 = vector.extract_strided_slice %27 {offsets = [24, 0], sizes = [8, 32], strides = [1, 1]} : vector<64x32xf32> to vector<8x32xf32>
    %121 = vector.extract_strided_slice %119 {offsets = [0, 0], sizes = [8, 32], strides = [1, 1]} : vector<8x96xf32> to vector<8x32xf32>
    %122 = arith.addf %120, %121 : vector<8x32xf32>
    %123 = arith.negf %122 : vector<8x32xf32>
    %124 = math.exp %123 : vector<8x32xf32>
    %cst_34 = arith.constant 1.000000e+00 : f32
    %125 = vector.broadcast %cst_34 : f32 to vector<8x32xf32>
    %126 = arith.addf %125, %124 : vector<8x32xf32>
    %127 = arith.divf %125, %126 : vector<8x32xf32>
    %128 = vector.extract_strided_slice %28 {offsets = [24, 0], sizes = [8, 32], strides = [1, 1]} : vector<64x32xf32> to vector<8x32xf32>
    %129 = vector.extract_strided_slice %119 {offsets = [0, 32], sizes = [8, 32], strides = [1, 1]} : vector<8x96xf32> to vector<8x32xf32>
    %130 = arith.addf %128, %129 : vector<8x32xf32>
    %131 = arith.negf %130 : vector<8x32xf32>
    %132 = math.exp %131 : vector<8x32xf32>
    %cst_35 = arith.constant 1.000000e+00 : f32
    %133 = vector.broadcast %cst_35 : f32 to vector<8x32xf32>
    %134 = arith.addf %133, %132 : vector<8x32xf32>
    %135 = arith.divf %133, %134 : vector<8x32xf32>
    %136 = vector.extract_strided_slice %29 {offsets = [24, 0], sizes = [8, 32], strides = [1, 1]} : vector<64x32xf32> to vector<8x32xf32>
    %137 = vector.extract_strided_slice %119 {offsets = [0, 64], sizes = [8, 32], strides = [1, 1]} : vector<8x96xf32> to vector<8x32xf32>
    %138 = arith.mulf %127, %137 : vector<8x32xf32>
    %139 = arith.addf %136, %138 : vector<8x32xf32>
    %140 = math.tanh %139 : vector<8x32xf32>
    %cst_36 = arith.constant 1.000000e+00 : f32
    %141 = vector.broadcast %cst_36 : f32 to vector<8x32xf32>
    %142 = arith.subf %141, %135 : vector<8x32xf32>
    %143 = arith.mulf %142, %140 : vector<8x32xf32>
    %144 = arith.mulf %135, %116 : vector<8x32xf32>
    %145 = arith.addf %143, %144 : vector<8x32xf32>
    %cst_37 = arith.constant dense<0.000000e+00> : vector<8x96xf32>
    %146 = tpu.matmul %145, %20, %cst_37 {dimension_numbers = #tpu.dot_dimension_numbers<[1], [0], [0], [1], [0, 0, 1, 1], [], []>} : vector<8x32xf32>, vector<32x96xf32>, vector<8x96xf32> -> vector<8x96xf32>
    %147 = vector.broadcast %22 : vector<1x96xf32> to vector<8x96xf32>
    %148 = arith.addf %146, %147 : vector<8x96xf32>
    %149 = vector.extract_strided_slice %27 {offsets = [32, 0], sizes = [8, 32], strides = [1, 1]} : vector<64x32xf32> to vector<8x32xf32>
    %150 = vector.extract_strided_slice %148 {offsets = [0, 0], sizes = [8, 32], strides = [1, 1]} : vector<8x96xf32> to vector<8x32xf32>
    %151 = arith.addf %149, %150 : vector<8x32xf32>
    %152 = arith.negf %151 : vector<8x32xf32>
    %153 = math.exp %152 : vector<8x32xf32>
    %cst_38 = arith.constant 1.000000e+00 : f32
    %154 = vector.broadcast %cst_38 : f32 to vector<8x32xf32>
    %155 = arith.addf %154, %153 : vector<8x32xf32>
    %156 = arith.divf %154, %155 : vector<8x32xf32>
    %157 = vector.extract_strided_slice %28 {offsets = [32, 0], sizes = [8, 32], strides = [1, 1]} : vector<64x32xf32> to vector<8x32xf32>
    %158 = vector.extract_strided_slice %148 {offsets = [0, 32], sizes = [8, 32], strides = [1, 1]} : vector<8x96xf32> to vector<8x32xf32>
    %159 = arith.addf %157, %158 : vector<8x32xf32>
    %160 = arith.negf %159 : vector<8x32xf32>
    %161 = math.exp %160 : vector<8x32xf32>
    %cst_39 = arith.constant 1.000000e+00 : f32
    %162 = vector.broadcast %cst_39 : f32 to vector<8x32xf32>
    %163 = arith.addf %162, %161 : vector<8x32xf32>
    %164 = arith.divf %162, %163 : vector<8x32xf32>
    %165 = vector.extract_strided_slice %29 {offsets = [32, 0], sizes = [8, 32], strides = [1, 1]} : vector<64x32xf32> to vector<8x32xf32>
    %166 = vector.extract_strided_slice %148 {offsets = [0, 64], sizes = [8, 32], strides = [1, 1]} : vector<8x96xf32> to vector<8x32xf32>
    %167 = arith.mulf %156, %166 : vector<8x32xf32>
    %168 = arith.addf %165, %167 : vector<8x32xf32>
    %169 = math.tanh %168 : vector<8x32xf32>
    %cst_40 = arith.constant 1.000000e+00 : f32
    %170 = vector.broadcast %cst_40 : f32 to vector<8x32xf32>
    %171 = arith.subf %170, %164 : vector<8x32xf32>
    %172 = arith.mulf %171, %169 : vector<8x32xf32>
    %173 = arith.mulf %164, %145 : vector<8x32xf32>
    %174 = arith.addf %172, %173 : vector<8x32xf32>
    %cst_41 = arith.constant dense<0.000000e+00> : vector<8x96xf32>
    %175 = tpu.matmul %174, %20, %cst_41 {dimension_numbers = #tpu.dot_dimension_numbers<[1], [0], [0], [1], [0, 0, 1, 1], [], []>} : vector<8x32xf32>, vector<32x96xf32>, vector<8x96xf32> -> vector<8x96xf32>
    %176 = vector.broadcast %22 : vector<1x96xf32> to vector<8x96xf32>
    %177 = arith.addf %175, %176 : vector<8x96xf32>
    %178 = vector.extract_strided_slice %27 {offsets = [40, 0], sizes = [8, 32], strides = [1, 1]} : vector<64x32xf32> to vector<8x32xf32>
    %179 = vector.extract_strided_slice %177 {offsets = [0, 0], sizes = [8, 32], strides = [1, 1]} : vector<8x96xf32> to vector<8x32xf32>
    %180 = arith.addf %178, %179 : vector<8x32xf32>
    %181 = arith.negf %180 : vector<8x32xf32>
    %182 = math.exp %181 : vector<8x32xf32>
    %cst_42 = arith.constant 1.000000e+00 : f32
    %183 = vector.broadcast %cst_42 : f32 to vector<8x32xf32>
    %184 = arith.addf %183, %182 : vector<8x32xf32>
    %185 = arith.divf %183, %184 : vector<8x32xf32>
    %186 = vector.extract_strided_slice %28 {offsets = [40, 0], sizes = [8, 32], strides = [1, 1]} : vector<64x32xf32> to vector<8x32xf32>
    %187 = vector.extract_strided_slice %177 {offsets = [0, 32], sizes = [8, 32], strides = [1, 1]} : vector<8x96xf32> to vector<8x32xf32>
    %188 = arith.addf %186, %187 : vector<8x32xf32>
    %189 = arith.negf %188 : vector<8x32xf32>
    %190 = math.exp %189 : vector<8x32xf32>
    %cst_43 = arith.constant 1.000000e+00 : f32
    %191 = vector.broadcast %cst_43 : f32 to vector<8x32xf32>
    %192 = arith.addf %191, %190 : vector<8x32xf32>
    %193 = arith.divf %191, %192 : vector<8x32xf32>
    %194 = vector.extract_strided_slice %29 {offsets = [40, 0], sizes = [8, 32], strides = [1, 1]} : vector<64x32xf32> to vector<8x32xf32>
    %195 = vector.extract_strided_slice %177 {offsets = [0, 64], sizes = [8, 32], strides = [1, 1]} : vector<8x96xf32> to vector<8x32xf32>
    %196 = arith.mulf %185, %195 : vector<8x32xf32>
    %197 = arith.addf %194, %196 : vector<8x32xf32>
    %198 = math.tanh %197 : vector<8x32xf32>
    %cst_44 = arith.constant 1.000000e+00 : f32
    %199 = vector.broadcast %cst_44 : f32 to vector<8x32xf32>
    %200 = arith.subf %199, %193 : vector<8x32xf32>
    %201 = arith.mulf %200, %198 : vector<8x32xf32>
    %202 = arith.mulf %193, %174 : vector<8x32xf32>
    %203 = arith.addf %201, %202 : vector<8x32xf32>
    %cst_45 = arith.constant dense<0.000000e+00> : vector<8x96xf32>
    %204 = tpu.matmul %203, %20, %cst_45 {dimension_numbers = #tpu.dot_dimension_numbers<[1], [0], [0], [1], [0, 0, 1, 1], [], []>} : vector<8x32xf32>, vector<32x96xf32>, vector<8x96xf32> -> vector<8x96xf32>
    %205 = vector.broadcast %22 : vector<1x96xf32> to vector<8x96xf32>
    %206 = arith.addf %204, %205 : vector<8x96xf32>
    %207 = vector.extract_strided_slice %27 {offsets = [48, 0], sizes = [8, 32], strides = [1, 1]} : vector<64x32xf32> to vector<8x32xf32>
    %208 = vector.extract_strided_slice %206 {offsets = [0, 0], sizes = [8, 32], strides = [1, 1]} : vector<8x96xf32> to vector<8x32xf32>
    %209 = arith.addf %207, %208 : vector<8x32xf32>
    %210 = arith.negf %209 : vector<8x32xf32>
    %211 = math.exp %210 : vector<8x32xf32>
    %cst_46 = arith.constant 1.000000e+00 : f32
    %212 = vector.broadcast %cst_46 : f32 to vector<8x32xf32>
    %213 = arith.addf %212, %211 : vector<8x32xf32>
    %214 = arith.divf %212, %213 : vector<8x32xf32>
    %215 = vector.extract_strided_slice %28 {offsets = [48, 0], sizes = [8, 32], strides = [1, 1]} : vector<64x32xf32> to vector<8x32xf32>
    %216 = vector.extract_strided_slice %206 {offsets = [0, 32], sizes = [8, 32], strides = [1, 1]} : vector<8x96xf32> to vector<8x32xf32>
    %217 = arith.addf %215, %216 : vector<8x32xf32>
    %218 = arith.negf %217 : vector<8x32xf32>
    %219 = math.exp %218 : vector<8x32xf32>
    %cst_47 = arith.constant 1.000000e+00 : f32
    %220 = vector.broadcast %cst_47 : f32 to vector<8x32xf32>
    %221 = arith.addf %220, %219 : vector<8x32xf32>
    %222 = arith.divf %220, %221 : vector<8x32xf32>
    %223 = vector.extract_strided_slice %29 {offsets = [48, 0], sizes = [8, 32], strides = [1, 1]} : vector<64x32xf32> to vector<8x32xf32>
    %224 = vector.extract_strided_slice %206 {offsets = [0, 64], sizes = [8, 32], strides = [1, 1]} : vector<8x96xf32> to vector<8x32xf32>
    %225 = arith.mulf %214, %224 : vector<8x32xf32>
    %226 = arith.addf %223, %225 : vector<8x32xf32>
    %227 = math.tanh %226 : vector<8x32xf32>
    %cst_48 = arith.constant 1.000000e+00 : f32
    %228 = vector.broadcast %cst_48 : f32 to vector<8x32xf32>
    %229 = arith.subf %228, %222 : vector<8x32xf32>
    %230 = arith.mulf %229, %227 : vector<8x32xf32>
    %231 = arith.mulf %222, %203 : vector<8x32xf32>
    %232 = arith.addf %230, %231 : vector<8x32xf32>
    %cst_49 = arith.constant dense<0.000000e+00> : vector<8x96xf32>
    %233 = tpu.matmul %232, %20, %cst_49 {dimension_numbers = #tpu.dot_dimension_numbers<[1], [0], [0], [1], [0, 0, 1, 1], [], []>} : vector<8x32xf32>, vector<32x96xf32>, vector<8x96xf32> -> vector<8x96xf32>
    %234 = vector.broadcast %22 : vector<1x96xf32> to vector<8x96xf32>
    %235 = arith.addf %233, %234 : vector<8x96xf32>
    %236 = vector.extract_strided_slice %27 {offsets = [56, 0], sizes = [8, 32], strides = [1, 1]} : vector<64x32xf32> to vector<8x32xf32>
    %237 = vector.extract_strided_slice %235 {offsets = [0, 0], sizes = [8, 32], strides = [1, 1]} : vector<8x96xf32> to vector<8x32xf32>
    %238 = arith.addf %236, %237 : vector<8x32xf32>
    %239 = arith.negf %238 : vector<8x32xf32>
    %240 = math.exp %239 : vector<8x32xf32>
    %cst_50 = arith.constant 1.000000e+00 : f32
    %241 = vector.broadcast %cst_50 : f32 to vector<8x32xf32>
    %242 = arith.addf %241, %240 : vector<8x32xf32>
    %243 = arith.divf %241, %242 : vector<8x32xf32>
    %244 = vector.extract_strided_slice %28 {offsets = [56, 0], sizes = [8, 32], strides = [1, 1]} : vector<64x32xf32> to vector<8x32xf32>
    %245 = vector.extract_strided_slice %235 {offsets = [0, 32], sizes = [8, 32], strides = [1, 1]} : vector<8x96xf32> to vector<8x32xf32>
    %246 = arith.addf %244, %245 : vector<8x32xf32>
    %247 = arith.negf %246 : vector<8x32xf32>
    %248 = math.exp %247 : vector<8x32xf32>
    %cst_51 = arith.constant 1.000000e+00 : f32
    %249 = vector.broadcast %cst_51 : f32 to vector<8x32xf32>
    %250 = arith.addf %249, %248 : vector<8x32xf32>
    %251 = arith.divf %249, %250 : vector<8x32xf32>
    %252 = vector.extract_strided_slice %29 {offsets = [56, 0], sizes = [8, 32], strides = [1, 1]} : vector<64x32xf32> to vector<8x32xf32>
    %253 = vector.extract_strided_slice %235 {offsets = [0, 64], sizes = [8, 32], strides = [1, 1]} : vector<8x96xf32> to vector<8x32xf32>
    %254 = arith.mulf %243, %253 : vector<8x32xf32>
    %255 = arith.addf %252, %254 : vector<8x32xf32>
    %256 = math.tanh %255 : vector<8x32xf32>
    %cst_52 = arith.constant 1.000000e+00 : f32
    %257 = vector.broadcast %cst_52 : f32 to vector<8x32xf32>
    %258 = arith.subf %257, %251 : vector<8x32xf32>
    %259 = arith.mulf %258, %256 : vector<8x32xf32>
    %260 = arith.mulf %251, %232 : vector<8x32xf32>
    %261 = arith.addf %259, %260 : vector<8x32xf32>
    %c0_53 = arith.constant 0 : index
    %c0_54 = arith.constant 0 : index
    %262 = vector.load %arg5[%c0_53, %c0_54] : memref<74x32xf32, #tpu.memory_space<vmem>>, vector<32x32xf32>
    %c32_55 = arith.constant 32 : index
    %c0_56 = arith.constant 0 : index
    %263 = vector.load %arg5[%c32_55, %c0_56] : memref<74x32xf32, #tpu.memory_space<vmem>>, vector<32x32xf32>
    %c73 = arith.constant 73 : index
    %c0_57 = arith.constant 0 : index
    %264 = vector.load %arg5[%c73, %c0_57] : memref<74x32xf32, #tpu.memory_space<vmem>>, vector<1x32xf32>
    %cst_58 = arith.constant dense<0.000000e+00> : vector<8x32xf32>
    %265 = tpu.matmul %261, %262, %cst_58 {dimension_numbers = #tpu.dot_dimension_numbers<[1], [0], [0], [1], [0, 0, 1, 1], [], []>} : vector<8x32xf32>, vector<32x32xf32>, vector<8x32xf32> -> vector<8x32xf32>
    %266 = vector.broadcast %264 : vector<1x32xf32> to vector<8x32xf32>
    %267 = arith.addf %265, %266 : vector<8x32xf32>
    %cst_59 = arith.constant dense<0.000000e+00> : vector<8x32xf32>
    %268 = tpu.matmul %18, %263, %cst_59 {dimension_numbers = #tpu.dot_dimension_numbers<[1], [0], [0], [1], [0, 0, 1, 1], [], []>} : vector<8x32xf32>, vector<32x32xf32>, vector<8x32xf32> -> vector<8x32xf32>
    %269 = arith.addf %267, %268 : vector<8x32xf32>
    %c0_60 = arith.constant 0 : index
    %c0_61 = arith.constant 0 : index
    %270 = vector.load %arg6[%c0_60, %c0_61] : memref<8x32xf32, #tpu.memory_space<vmem>>, vector<8x32xf32>
    tpu.vector_store %arg6[%c0_60, %c0_61], %269 {strides = array<i32>} : memref<8x32xf32, #tpu.memory_space<vmem>>, vector<8x32xf32>,
    return
  }
  func.func @transform_0(%arg0: i32) -> (i32, i32, i32) {
    %c0_i32 = arith.constant 0 : i32
    %c0_i32_0 = arith.constant 0 : i32
    %c0_i32_1 = arith.constant 0 : i32
    %c0_i32_2 = arith.constant 0 : i32
    return %c0_i32, %c0_i32_0, %c0_i32_1 : i32, i32, i32
  }
  func.func @transform_1(%arg0: i32) -> (i32, i32) {
    %c0_i32 = arith.constant 0 : i32
    %c0_i32_0 = arith.constant 0 : i32
    %c0_i32_1 = arith.constant 0 : i32
    return %c0_i32, %c0_i32_0 : i32, i32
  }
  func.func @transform_2(%arg0: i32) -> (i32, i32) {
    %c0_i32 = arith.constant 0 : i32
    %c0_i32_0 = arith.constant 0 : i32
    %c0_i32_1 = arith.constant 0 : i32
    return %c0_i32, %c0_i32_0 : i32, i32
  }
  func.func @transform_3(%arg0: i32) -> (i32, i32) {
    %c0_i32 = arith.constant 0 : i32
    %c0_i32_0 = arith.constant 0 : i32
    %c0_i32_1 = arith.constant 0 : i32
    return %c0_i32, %c0_i32_0 : i32, i32
  }
  func.func @transform_4(%arg0: i32) -> (i32, i32) {
    %c0_i32 = arith.constant 0 : i32
    %c0_i32_0 = arith.constant 0 : i32
    %c0_i32_1 = arith.constant 0 : i32
    return %c0_i32, %c0_i32_0 : i32, i32
  }
  func.func @transform_5(%arg0: i32) -> (i32, i32) {
    %c0_i32 = arith.constant 0 : i32
    %c0_i32_0 = arith.constant 0 : i32
    %c0_i32_1 = arith.constant 0 : i32
    return %c0_i32, %c0_i32_0 : i32, i32
  }
}

</mosaic_0001>

<bundles_post_ra>
// kernel: squeeze.10
= control target key start
LH: loop header
LB: loop body
LE: loop exit
PB: predicated region body
PF: predicated region fallthrough
CT: control target
= control target key end

     0   :  { %s88_s8 = smov 112   ;;  %s89_s11 = smov 80   ;;  %vm3_vm0 = vcmask 130048   ;;  %vm9_vm1 = vcmask 1048448   ;;  %vm15_vm2 = vcmask 917248   ;;  %vm21_vm3 = vcmask 786048   ;;  %s141_s0 = inlined_call_operand.vmem [shape: f32[2,1,16,16], index: 0, kind: input, shape index: {}]   ;;  %s142_s1 = inlined_call_operand.vmem [shape: f32[2,1,256], index: 1, kind: output, shape index: {}]  }
   0x1   :  { %v71_v0 = vld [vmem:[%s141_s0 + $0x7] ss:$8 sm:$0xf]   ;;  %v73_v1 = vld [vmem:[%s141_s0 + $0x5] ss:$8 sm:$0xf]  }
   0x2   :  { %7 = vrot.lane.b32.xlu0 %v71_v0, %s88_s8  ;;  %19 = vrot.lane.b32.xlu1 %v73_v1, %s89_s11  ;;  %v75_v2 = vld [vmem:[%s141_s0 + $0x3] ss:$8 sm:$0xf]   ;;  %s90_s14 = smov 48   ;;  %s91_s19 = smov 96   ;;  %vm27_vm4 = vcmask 654848  }
   0x3   :  { %31 = vrot.lane.b32.xlu2 %v75_v2, %s90_s14  ;;  %v72_v3 = vld [vmem:[%s141_s0 + $0x6] ss:$8 sm:$0xf]   ;;  %v74_v4 = vld [vmem:[%s141_s0 + $0x4] ss:$8 sm:$0xf]  }
   0x4   :  { %s92_s20 = smov 64   ;;  %v76_v5 = vld [vmem:[%s141_s0 + $0x2] ss:$8 sm:$0xf]   ;;  %s93_s23 = smov 32   ;;  %vm33_vm5 = vcmask 523648  }
   0x5   :  { %v77_v6 = vld [vmem:[%s141_s0 + $0x1] ss:$8 sm:$0xf]   ;;  %s94_s26 = smov 16   ;;  %vm39_vm6 = vcmask 392448   ;;  %vm45_vm7 = vcmask 261248  }
   0x6   :  { %v2_v7 = vld [vmem:[%s141_s0] ss:$8 sm:$0xf]  }
   0x7   :  { %4 = vst.msk [vmem:[#allocation0] ss:$8 sm:$0xf] %vm3_vm0, %v2_v7  }
   0xa   :  { %13 = vrot.lane.b32.xlu0 %v72_v3, %s91_s19  ;;  %25 = vrot.lane.b32.xlu1 %v74_v4, %s92_s20 }
   0xb   :  { %37 = vrot.lane.b32.xlu2 %v76_v5, %s93_s23 }
  0x12   :  { %43 = vrot.lane.b32.xlu0 %v77_v6, %s94_s26 }
  0x5d   :  { %v32_v8 = vpop.permute.xlu2 %31  }
  0x65   :  { %v38_v9 = vpop.permute.xlu2 %37  }
  0x74   :  { %v8_v10 = vpop.permute.xlu0 %7   ;;  %v20_v11 = vpop.permute.xlu1 %19  }
  0x75   :  { %10 = vst.msk [vmem:[#allocation0] ss:$8 sm:$0xf] %vm9_vm1, %v8_v10  }
  0x7c   :  { %v14_v12 = vpop.permute.xlu0 %13   ;;  %v26_v13 = vpop.permute.xlu1 %25  }
  0x7d   :  { %16 = vst.msk [vmem:[#allocation0] ss:$8 sm:$0xf] %vm15_vm2, %v14_v12  }
  0x7e   :  { %22 = vst.msk [vmem:[#allocation0] ss:$8 sm:$0xf] %vm21_vm3, %v20_v11  }
  0x7f   :  { %28 = vst.msk [vmem:[#allocation0] ss:$8 sm:$0xf] %vm27_vm4, %v26_v13  }
  0x80   :  { %34 = vst.msk [vmem:[#allocation0] ss:$8 sm:$0xf] %vm33_vm5, %v32_v8  }
  0x81   :  { %40 = vst.msk [vmem:[#allocation0] ss:$8 sm:$0xf] %vm39_vm6, %v38_v9  }
  0x84   :  { %v44_v14 = vpop.permute.xlu0 %43  }
  0x85   :  { %46 = vst.msk [vmem:[#allocation0] ss:$8 sm:$0xf] %vm45_vm7, %v44_v14  }
  0x8c   :  { %v49_v15 = vld [vmem:[#allocation0] sm:$0x1]  ;;  %v54_v16 = vld [vmem:[#allocation0 + $0x8] sm:$0x1]  ;;  %v60_v17 = vld [vmem:[#allocation0 + $0x10] sm:$0x1] }
  0x8d   :  { %52 = vst [vmem:[%s142_s1] sm:$0x1] %v49_v15  ;;  %v66_v18 = vld [vmem:[#allocation0 + $0x18] sm:$0x1] }
  0x8e   :  { %78 = vst [vmem:[%s142_s1 + $0x1] sm:$0x1] %v54_v16 }
  0x8f   :  { %79 = vst [vmem:[%s142_s1 + $0x2] sm:$0x1] %v60_v17 }
  0x90   :  { %80 = vst [vmem:[%s142_s1 + $0x3] sm:$0x1] %v66_v18 }

// kernel: san_forward.1
= control target key start
LH: loop header
LB: loop body
LE: loop exit
PB: predicated region body
PF: predicated region fallthrough
CT: control target
= control target key end

     0   :  { %vm33_vm0 = vcmask 1041408   ;;  %vm29_vm1 = vcmask 80896   ;;  %s909_s8 = smov 64   ;;  %vm195_vm2 = vcmask 261120   ;;  %s910_s17 = smov 96   ;;  %vm144_vm15 = vcmask 1041409   ;;  %s1202_s0 = inlined_call_operand.vmem [shape: f32[2,10,256], index: 0, kind: input, shape index: {}]   ;;  %s1203_s1 = inlined_call_operand.vmem [shape: f32[8,10], index: 1, kind: input, shape index: {}]   ;;  %s1204_s3 = inlined_call_operand.vmem [shape: f32[66,96], index: 3, kind: input, shape index: {}]   ;;  %s1205_s2 = inlined_call_operand.vmem [shape: f32[64,32], index: 2, kind: input, shape index: {}]   ;;  %s1206_s4 = inlined_call_operand.vmem [shape: f32[74,32], index: 4, kind: input, shape index: {}]   ;;  %s1207_s5 = inlined_call_operand.vmem [shape: f32[8,32], index: 5, kind: output, shape index: {}]  }
   0x1   :  { %v22_v0 = vld [vmem:[%s1202_s0 + $0x10] sm:$0x3]  ;;  %v23_v1 = vld [vmem:[%s1202_s0 + $0x18] sm:$0x3]  ;;  %v20_v2 = vld [vmem:[%s1202_s0] sm:$0xff] }
   0x2   :  { %813 = vmatpush.msk.msra.mxu0 %vm33_vm0, %v22_v0  ;;  %815 = vmatpush.msk.msra.mxu1 %vm33_vm0, %v23_v1  ;;  %v21_v3 = vld [vmem:[%s1202_s0 + $0x8] sm:$0xff]  ;;  %v958_v4 = vld [vmem:[%s1203_s1] sm:$0xff]  ;;  %v179_v5 = vld [vmem:[%s1204_s3 + $0x18] sm:$0xff] }
   0x3   :  { %v966_v6 = vld [vmem:[%s1204_s3 + $0x41] ss:$0 sm:$0xff]  ;;  %v178_v7 = vld [vmem:[%s1204_s3 + $0x10] sm:$0xff]  ;;  %v177_v8 = vld [vmem:[%s1204_s3 + $0x8] sm:$0xff] }
   0x4   :  { %55 = vmatpush.msra.mxu0 %v20_v2  ;;  %75 = vmatpush.msra.mxu1 %v21_v3  ;;  %v176_v9 = vld [vmem:[%s1204_s3] sm:$0xff]  ;;  %v26_v34 = vld [vmem:[%s1202_s0 + $0x30] sm:$0x3]  ;;  %v27_v35 = vld [vmem:[%s1202_s0 + $0x38] sm:$0x3] }
   0x5   :  { %814 = vmatmul.msk.f32.vlgmr.msra.gmra.mxu0 %vm29_vm1, %v958_v4  ;;  %816 = vmatmul.msk.f32.vlgmr.msra.gmra.mxu1 %vm29_vm1, %v958_v4  ;;  %v186_v10 = vld [vmem:[%s1205_s2] sm:$0xff]  ;;  %v25_v37 = vld [vmem:[%s1202_s0 + $0x28] sm:$0xff]  ;;  %v1022_v39 = vld [vmem:[%s1204_s3 + $0x38] sm:$0xff] }
   0x6   :  { %232 = vmatpush.msrb.mxu1 %v179_v5  ;;  %283 = vrot.lane.b32.xlu0 %v966_v6, %s909_s8  ;;  %v992_v12 = vld [vmem:[%s1204_s3 + $0x40] ss:$0 sm:$0xff]  ;;  %v191_v38 = vld [vmem:[%s1205_s2 + $0x28] sm:$0xff]  ;;  %v1028_v40 = vld [vmem:[%s1204_s3 + $0x30] sm:$0xff] }
   0x7   :  { %v24_v36 = vld [vmem:[%s1202_s0 + $0x20] sm:$0xff]  ;;  %817 = vmatpush.msk.msra.mxu2 %vm33_vm0, %v26_v34  ;;  %819 = vmatpush.msk.msra.mxu3 %vm33_vm0, %v27_v35  ;;  %v1035_v41 = vld [vmem:[%s1204_s3 + $0x28] sm:$0xff] }
   0x8   :  { %233 = vmatpush.msrb.mxu1 %v178_v7  ;;  %v1042_v42 = vld [vmem:[%s1204_s3 + $0x20] sm:$0xff]  ;;  %v187_v48 = vld [vmem:[%s1205_s2 + $0x8] sm:$0xff] }
   0x9   :  { %101 = vmatpush.msra.mxu2 %v24_v36  ;;  %121 = vmatpush.msra.mxu3 %v25_v37 }
   0xa   :  { %234 = vmatpush.msrb.mxu1 %v177_v8  ;;  %818 = vmatmul.msk.f32.vlgmr.msra.gmra.mxu2 %vm29_vm1, %v958_v4 }
   0xb   :  { %820 = vmatmul.msk.f32.vlgmr.msra.gmra.mxu3 %vm29_vm1, %v958_v4  ;;  %847 = vmatpush.msrb.mxu2 %v179_v5  ;;  %vm151_vm1 = vcmask 64512  }
   0xc   :  { %235 = vmatpush.msrb.mxu1 %v176_v9  ;;  %848 = vmatpush.msrb.mxu3 %v179_v5 }
   0xd   :  { %822 = vmatmul.msk.f32.vlgmr.msrb.gmra.mxu1 %vm195_vm2, %v186_v10  ;;  %849 = vmatpush.msrb.mxu2 %v178_v7 }
   0xe   :  { %850 = vmatpush.msrb.mxu3 %v178_v7 }
   0xf   :  { %851 = vmatpush.msrb.mxu2 %v177_v8 }
  0x10   :  { %852 = vmatpush.msrb.mxu3 %v177_v8 }
  0x11   :  { %853 = vmatpush.msrb.mxu2 %v176_v9 }
  0x12   :  { %854 = vmatpush.msrb.mxu3 %v176_v9  ;;  %827 = vmatmul.msk.f32.vlgmr.msrb.gmra.mxu2 %vm195_vm2, %v191_v38 }
  0x13   :  { %318 = vmatpush.msra.mxu2 %v1022_v39 }
  0x14   :  { %382 = vmatpush.msra.mxu3 %v1022_v39 }
  0x15   :  { %319 = vmatpush.msra.mxu2 %v1028_v40  ;;  %823 = vmatmul.msk.f32.gmra.mxu1 %vm195_vm2, %v187_v48 }
  0x16   :  { %383 = vmatpush.msra.mxu3 %v1028_v40 }
  0x17   :  { %320 = vmatpush.msra.mxu2 %v1035_v41 }
  0x18   :  { %384 = vmatpush.msra.mxu3 %v1035_v41 }
  0x19   :  { %321 = vmatpush.msra.mxu2 %v1042_v42 }
  0x1a   :  { %385 = vmatpush.msra.mxu3 %v1042_v42 }
  0x1b   :  { %510 = vmatpush.msrb.mxu2 %v1022_v39 }
  0x1d   :  { %511 = vmatpush.msrb.mxu2 %v1028_v40 }
  0x1f   :  { %512 = vmatpush.msrb.mxu2 %v1035_v41 }
  0x21   :  { %513 = vmatpush.msrb.mxu2 %v1042_v42 }
  0x78   :  { %v284_v26 = vpop.permute.xlu0 %283 }
  0x82   :  { %v987_v11 = vpop.f32.mrf.mxu1 }
  0x8a   :  { %v237_v13 = vpop.f32.mrf.mxu1 }
  0x8b   :  { %v238_v14 = vadd.f32 %v992_v12, %v237_v13 }
  0x8d   :  { %v262_v15 = vadd.f32 %v966_v6, %v238_v14  ;;  %v1062_v50 = vpop.f32.mrf.mxu2 }
  0x8f   :  { %v830_v16 = vmul.f32 -1.442695, %v262_v15  ;;  %v193_v15 = vld [vmem:[%s1205_s2 + $0x38] sm:$0xff] }
  0x91   :  { %861 = vpow2.f32 %v830_v16 }
  0x92   :  { %v240_v54 = vpop.f32.mrf.mxu1 }
  0x93   :  { %v241_v55 = vadd.f32 %v992_v12, %v240_v54 }
  0x95   :  { %v1064_v51 = vpop.f32.mrf.mxu2 }
  0x97   :  { %v862_v17 = vpop.eup %861 }
  0x98   :  { %v266_v18 = vadd.f32 1.0, %v862_v17 }
  0x9a   :  { %863 = vrcp.f32 %v266_v18  ;;  %v278_v22 = vand.u32 2147483648, %v266_v18  ;;  %v276_v24 = vand.u32 2147483647, %v266_v18  ;;  %vm272_vm4 = vweird.f32 %v266_v18 }
  0x9c   :  { %v279_v27 = vor.u32 1.1754944e-38, %v278_v22  ;;  %vm277_vm6 = vcmp.eq.f32.partialorder %v276_v24, 8.507059e+37 }
  0xa0   :  { %v864_v19 = vpop.eup %863 }
  0xa1   :  { %v268_v20 = vmul.f32 %v864_v19, %v266_v18  ;;  %vm273_vm3 = vweird.f32 %v864_v19 }
  0xa2   :  { %vm274_vm5 = vmor %vm272_vm4, %vm273_vm3 }
  0xa3   :  { %v269_v21 = vsub.f32 1.0, %v268_v20 }
  0xa5   :  { %v270_v23 = vmul.f32 %v864_v19, %v269_v21  ;;  %v188_v21 = vld [vmem:[%s1205_s2 + $0x10] sm:$0xff] }
  0xa6   :  { %824 = vmatmul.msk.f32.gmra.mxu1 %vm195_vm2, %v188_v21 }
  0xa7   :  { %v271_v25 = vadd.f32 %v864_v19, %v270_v23  ;;  %v123_v23 = vpop.f32.mrf.mxu3 }
  0xa9   :  { %v275_v28 = vsel %vm274_vm5, %v864_v19, %v271_v25 }
  0xaa   :  { %v280_v29 = vsel %vm277_vm6, %v279_v27, %v275_v28  ;;  %v57_v28 = vpop.f32.mrf.mxu0 }
  0xab   :  { %v286_v30 = vmul.f32 %v284_v26, %v280_v29  ;;  %v293_v43 = vsub.f32 1.0, %v280_v29  ;;  %v299_v45 = vmul.f32 0.0, %v280_v29 }
  0xad   :  { %288 = vrot.lane.b32.xlu0 %v286_v30, %s909_s8  ;;  %v126_v30 = vmax.f32 %v57_v28, 0.0 }
 0x11f   :  { %v289_v31 = vpop.permute.xlu0 %288 }
 0x120   :  { %v291_v32 = vadd.f32 %v289_v31, %v238_v14  ;;  %v192_v14 = vld [vmem:[%s1205_s2 + $0x30] sm:$0xff]  ;;  %v127_v31 = vmax.f32 %v987_v11, 0.0 }
 0x121   :  { %828 = vmatmul.msk.f32.vlgmr.msrb.gmra.mxu3 %vm195_vm2, %v192_v14 }
 0x122   :  { %865 = vtanh.f32 %v291_v32  ;;  %574 = vmatpush.msrb.mxu3 %v1022_v39 }
 0x123   :  { %v243_v29 = vpop.f32.mrf.mxu1 }
 0x124   :  { %575 = vmatpush.msrb.mxu3 %v1028_v40  ;;  %v244_v32 = vadd.f32 %v992_v12, %v243_v29 }
 0x126   :  { %576 = vmatpush.msrb.mxu3 %v1035_v41 }
 0x128   :  { %v866_v33 = vpop.eup %865  ;;  %577 = vmatpush.msrb.mxu3 %v1042_v42 }
 0x129   :  { %295 = vrot.lane.b32.xlu1 %v866_v33, %s910_s17  ;;  %829 = vmatmul.msk.f32.gmra.mxu3 %vm195_vm2, %v193_v15  ;;  %v130_v33 = vadd.f32 %v127_v31, %v126_v30  ;;  %v189_v15 = vld [vmem:[%s1205_s2 + $0x18] sm:$0xff] }
 0x12a   :  { %825 = vmatmul.msk.f32.gmra.mxu1 %vm195_vm2, %v189_v15 }
 0x19b   :  { %v296_v44 = vpop.permute.xlu1 %295 }
 0x19c   :  { %v298_v46 = vmul.f32 %v296_v44, %v293_v43 }
 0x19e   :  { %v300_v47 = vadd.f32 %v299_v45, %v298_v46 }
 0x1a0   :  { %302 = vrot.lane.b32.xlu1 %v300_v47, %s910_s17 }
 0x1a4   :  { %v1092_v24 = vpop.f32.mrf.mxu3 }
 0x1ac   :  { %v1094_v25 = vpop.f32.mrf.mxu3 }
 0x212   :  { %v303_v49 = vpop.permute.xlu1 %302 }
 0x213   :  { %831 = vmatmul.msk.f32.vlgmr.msra.gmra.mxu2 %vm195_vm2, %v303_v49 }
 0x214   :  { %702 = vmatpush.msra.mxu2 %v1022_v39 }
 0x216   :  { %703 = vmatpush.msra.mxu2 %v1028_v40 }
 0x218   :  { %704 = vmatpush.msra.mxu2 %v1035_v41 }
 0x21a   :  { %705 = vmatpush.msra.mxu2 %v1042_v42 }
 0x296   :  { %v323_v52 = vpop.f32.mrf.mxu2 }
 0x297   :  { %v324_v53 = vadd.f32 %v966_v6, %v323_v52 }
 0x299   :  { %347 = vrot.lane.b32.xlu2 %v324_v53, %s909_s8  ;;  %v326_v56 = vadd.f32 %v324_v53, %v241_v55 }
 0x29b   :  { %v832_v57 = vmul.f32 -1.442695, %v326_v56  ;;  %v129_v56 = vmax.f32 %v123_v23, 0.0 }
 0x29d   :  { %867 = vpow2.f32 %v832_v57 }
 0x2a3   :  { %v868_v58 = vpop.eup %867 }
 0x2a4   :  { %v330_v59 = vadd.f32 1.0, %v868_v58 }
 0x2a6   :  { %869 = vrcp.f32 %v330_v59  ;;  %v342_v1 = vand.u32 2147483648, %v330_v59  ;;  %vm336_vm8 = vweird.f32 %v330_v59  ;;  %v340_v2 = vand.u32 2147483647, %v330_v59 }
 0x2a8   :  { %v343_v4 = vor.u32 1.1754944e-38, %v342_v1  ;;  %vm341_vm10 = vcmp.eq.f32.partialorder %v340_v2, 8.507059e+37 }
 0x2ac   :  { %v870_v60 = vpop.eup %869 }
 0x2ad   :  { %v332_v61 = vmul.f32 %v870_v60, %v330_v59  ;;  %vm337_vm7 = vweird.f32 %v870_v60 }
 0x2ae   :  { %vm338_vm9 = vmor %vm336_vm8, %vm337_vm7 }
 0x2af   :  { %v333_v62 = vsub.f32 1.0, %v332_v61  ;;  %v148_v61 = vld [vmem:[%s1206_s4 + $0x40] sm:$0xff] }
 0x2b0   :  { %170 = vmatpush.msrb.mxu0 %v148_v61 }
 0x2b1   :  { %v334_v63 = vmul.f32 %v870_v60, %v333_v62 }
 0x2b2   :  { %446 = vmatpush.msra.mxu0 %v1022_v39 }
 0x2b3   :  { %v335_v0 = vadd.f32 %v870_v60, %v334_v63 }
 0x2b4   :  { %447 = vmatpush.msra.mxu0 %v1028_v40 }
 0x2b5   :  { %v339_v3 = vsel %vm338_vm9, %v870_v60, %v335_v0 }
 0x2b6   :  { %v344_v7 = vsel %vm341_vm10, %v343_v4, %v339_v3  ;;  %448 = vmatpush.msra.mxu0 %v1035_v41 }
 0x2b7   :  { %v357_v16 = vsub.f32 1.0, %v344_v7  ;;  %v363_v18 = vmul.f32 %v344_v7, %v300_v47 }
 0x2b8   :  { %449 = vmatpush.msra.mxu0 %v1042_v42 }
 0x2f3   :  { %v348_v5 = vpop.permute.xlu2 %347 }
 0x2f4   :  { %v350_v8 = vmul.f32 %v348_v5, %v344_v7 }
 0x2f6   :  { %352 = vrot.lane.b32.xlu2 %v350_v8, %s909_s8 }
 0x350   :  { %v353_v9 = vpop.permute.xlu2 %352 }
 0x351   :  { %v355_v10 = vadd.f32 %v353_v9, %v241_v55  ;;  %v128_v55 = vmax.f32 %v1062_v50, 0.0  ;;  %v140_v50 = vlaneseq }
 0x353   :  { %871 = vtanh.f32 %v355_v10  ;;  %v133_v57 = vadd.f32 %v129_v56, %v128_v55  ;;  %v141_v63 = vand.u32 127, %v140_v50 }
 0x359   :  { %v872_v13 = vpop.eup %871 }
 0x35a   :  { %359 = vrot.lane.b32.xlu0 %v872_v13, %s910_s17 }
 0x3cc   :  { %v360_v17 = vpop.permute.xlu0 %359 }
 0x3cd   :  { %v362_v19 = vmul.f32 %v360_v17, %v357_v16  ;;  %v246_v16 = vpop.f32.mrf.mxu1 }
 0x3ce   :  { %v247_v17 = vadd.f32 %v992_v12, %v246_v16 }
 0x3cf   :  { %v1083_v20 = vadd.f32 %v363_v18, %v362_v19 }
 0x3d1   :  { %366 = vrot.lane.b32.xlu1 %v1083_v20, %s910_s17 }
 0x443   :  { %v367_v22 = vpop.permute.xlu1 %366 }
 0x444   :  { %833 = vmatmul.msk.f32.vlgmr.msra.gmra.mxu3 %vm195_vm2, %v367_v22 }
 0x4c7   :  { %v387_v26 = vpop.f32.mrf.mxu3 }
 0x4c8   :  { %v388_v27 = vadd.f32 %v966_v6, %v387_v26 }
 0x4ca   :  { %411 = vrot.lane.b32.xlu2 %v388_v27, %s909_s8  ;;  %v390_v34 = vadd.f32 %v388_v27, %v244_v32 }
 0x4cc   :  { %v834_v35 = vmul.f32 -1.442695, %v390_v34 }
 0x4ce   :  { %873 = vpow2.f32 %v834_v35 }
 0x4d4   :  { %v874_v36 = vpop.eup %873 }
 0x4d5   :  { %v394_v37 = vadd.f32 1.0, %v874_v36 }
 0x4d7   :  { %875 = vrcp.f32 %v394_v37  ;;  %v406_v47 = vand.u32 2147483648, %v394_v37  ;;  %vm400_vm12 = vweird.f32 %v394_v37  ;;  %v404_v48 = vand.u32 2147483647, %v394_v37 }
 0x4d9   :  { %v407_v49 = vor.u32 1.1754944e-38, %v406_v47  ;;  %vm405_vm14 = vcmp.eq.f32.partialorder %v404_v48, 8.507059e+37  ;;  %v190_v48 = vld [vmem:[%s1205_s2 + $0x20] sm:$0xff] }
 0x4da   :  { %826 = vmatmul.msk.f32.gmra.mxu1 %vm195_vm2, %v190_v48  ;;  %v755_v48 = vld [vmem:[%s1206_s4 + $0x30] sm:$0xff] }
 0x4dd   :  { %v876_v38 = vpop.eup %875 }
 0x4de   :  { %v396_v43 = vmul.f32 %v876_v38, %v394_v37  ;;  %vm401_vm11 = vweird.f32 %v876_v38 }
 0x4df   :  { %vm402_vm13 = vmor %vm400_vm12, %vm401_vm11 }
 0x4e0   :  { %v397_v44 = vsub.f32 1.0, %v396_v43 }
 0x4e2   :  { %v398_v45 = vmul.f32 %v876_v38, %v397_v44 }
 0x4e4   :  { %v399_v46 = vadd.f32 %v876_v38, %v398_v45 }
 0x4e6   :  { %v403_v11 = vsel %vm402_vm13, %v876_v38, %v399_v46 }
 0x4e7   :  { %v408_v53 = vsel %vm405_vm14, %v407_v49, %v403_v11 }
 0x4e8   :  { %v421_v8 = vsub.f32 1.0, %v408_v53  ;;  %v427_v10 = vmul.f32 %v408_v53, %v1083_v20 }
 0x4f3   :  { %131 = vadd.xlane.f32.xlu2 %v130_v33 }
 0x524   :  { %v412_v52 = vpop.permute.xlu2 %411 }
 0x525   :  { %v414_v54 = vmul.f32 %v412_v52, %v408_v53 }
 0x527   :  { %416 = vrot.lane.b32.xlu0 %v414_v54, %s909_s8 }
 0x551   :  { %134 = vadd.xlane.f32.xlu0 %v133_v57 }
 0x557   :  { %v249_v53 = vpop.f32.mrf.mxu1 }
 0x558   :  { %v250_v54 = vadd.f32 %v992_v12, %v249_v53 }
 0x566   :  { %v132_v62 = vpop.xlane.xlu2 %131 }
 0x567   :  { %v136_v0 = vmul.f32 0.00390625, %v132_v62 }
 0x569   :  { %v142_v3 = vperm.slane %v136_v0, %v141_v63 }
 0x599   :  { %v417_v58 = vpop.permute.xlu0 %416 }
 0x59a   :  { %v419_v59 = vadd.f32 %v417_v58, %v244_v32 }
 0x59c   :  { %877 = vtanh.f32 %v419_v59 }
 0x5a2   :  { %v878_v60 = vpop.eup %877 }
 0x5a3   :  { %423 = vrot.lane.b32.xlu1 %v878_v60, %s910_s17 }
 0x5c4   :  { %v135_v1 = vpop.xlane.xlu0 %134 }
 0x5c5   :  { %v137_v2 = vmul.f32 0.00390625, %v135_v1 }
 0x5c7   :  { %v143_v4 = vperm.slane %v137_v2, %v141_v63 }
 0x5c9   :  { %v145_v5 = vsel %vm144_vm15, %v143_v4, %v142_v3 }
 0x5ca   :  { %v147_v7 = vsel %vm33_vm0, %v145_v5, 0.0 }
 0x5cb   :  { %821 = vmatmul.msk.f32.vlgmr.msrb.gmra.mxu0 %vm151_vm1, %v147_v7 }
 0x5cc   :  { %638 = vmatpush.msrb.mxu0 %v1022_v39 }
 0x5ce   :  { %639 = vmatpush.msrb.mxu0 %v1028_v40 }
 0x5d0   :  { %640 = vmatpush.msrb.mxu0 %v1035_v41 }
 0x5d2   :  { %641 = vmatpush.msrb.mxu0 %v1042_v42 }
 0x615   :  { %v424_v9 = vpop.permute.xlu1 %423 }
 0x616   :  { %v426_v13 = vmul.f32 %v424_v9, %v421_v8 }
 0x618   :  { %v428_v14 = vadd.f32 %v427_v10, %v426_v13 }
 0x61a   :  { %430 = vrot.lane.b32.xlu1 %v428_v14, %s910_s17 }
 0x648   :  { %v1122_v40 = vpop.f32.mrf.mxu0 }
 0x68c   :  { %v431_v39 = vpop.permute.xlu1 %430 }
 0x68d   :  { %835 = vmatmul.msk.f32.vlgmr.msra.gmra.mxu0 %vm195_vm2, %v431_v39 }
 0x70a   :  { %v451_v41 = vpop.f32.mrf.mxu0 }
 0x70b   :  { %v452_v42 = vadd.f32 %v966_v6, %v451_v41 }
 0x70d   :  { %475 = vrot.lane.b32.xlu1 %v452_v42, %s909_s8  ;;  %v454_v18 = vadd.f32 %v452_v42, %v247_v17 }
 0x70f   :  { %v836_v19 = vmul.f32 -1.442695, %v454_v18 }
 0x711   :  { %879 = vpow2.f32 %v836_v19 }
 0x717   :  { %v880_v20 = vpop.eup %879 }
 0x718   :  { %v458_v21 = vadd.f32 1.0, %v880_v20 }
 0x71a   :  { %881 = vrcp.f32 %v458_v21  ;;  %v470_v29 = vand.u32 2147483648, %v458_v21  ;;  %vm464_vm3 = vweird.f32 %v458_v21  ;;  %v468_v30 = vand.u32 2147483647, %v458_v21 }
 0x71c   :  { %v471_v32 = vor.u32 1.1754944e-38, %v470_v29  ;;  %vm469_vm5 = vcmp.eq.f32.partialorder %v468_v30, 8.507059e+37 }
 0x720   :  { %v882_v22 = vpop.eup %881 }
 0x721   :  { %v460_v23 = vmul.f32 %v882_v22, %v458_v21  ;;  %vm465_vm0 = vweird.f32 %v882_v22 }
 0x722   :  { %vm466_vm4 = vmor %vm464_vm3, %vm465_vm0 }
 0x723   :  { %v461_v26 = vsub.f32 1.0, %v460_v23 }
 0x725   :  { %v462_v27 = vmul.f32 %v882_v22, %v461_v26 }
 0x727   :  { %v463_v28 = vadd.f32 %v882_v22, %v462_v27 }
 0x729   :  { %v467_v31 = vsel %vm466_vm4, %v882_v22, %v463_v28 }
 0x72a   :  { %v472_v34 = vsel %vm469_vm5, %v471_v32, %v467_v31 }
 0x72b   :  { %v485_v43 = vsub.f32 1.0, %v472_v34  ;;  %v491_v45 = vmul.f32 %v472_v34, %v428_v14 }
 0x77f   :  { %v476_v33 = vpop.permute.xlu1 %475 }
 0x780   :  { %v478_v35 = vmul.f32 %v476_v33, %v472_v34 }
 0x782   :  { %480 = vrot.lane.b32.xlu1 %v478_v35, %s909_s8 }
 0x7f4   :  { %v481_v36 = vpop.permute.xlu1 %480 }
 0x7f5   :  { %v483_v37 = vadd.f32 %v481_v36, %v247_v17  ;;  %v253_v17 = vadd.f32 %v992_v12, %v1064_v51 }
 0x7f7   :  { %883 = vtanh.f32 %v483_v37 }
 0x7fd   :  { %v884_v38 = vpop.eup %883 }
 0x7fe   :  { %487 = vrot.lane.b32.xlu1 %v884_v38, %s910_s17 }
 0x870   :  { %v488_v44 = vpop.permute.xlu1 %487 }
 0x871   :  { %v490_v46 = vmul.f32 %v488_v44, %v485_v43 }
 0x873   :  { %v492_v47 = vadd.f32 %v491_v45, %v490_v46 }
 0x875   :  { %494 = vrot.lane.b32.xlu1 %v492_v47, %s910_s17 }
 0x8e7   :  { %v495_v11 = vpop.permute.xlu1 %494 }
 0x8e8   :  { %837 = vmatmul.msk.f32.vlgmr.msrb.gmra.mxu2 %vm195_vm2, %v495_v11  ;;  %v754_v11 = vld [vmem:[%s1206_s4 + $0x28] sm:$0xff] }
 0x96b   :  { %v515_v49 = vpop.f32.mrf.mxu2 }
 0x96c   :  { %v516_v52 = vadd.f32 %v966_v6, %v515_v49  ;;  %v753_v49 = vld [vmem:[%s1206_s4 + $0x20] sm:$0xff] }
 0x96e   :  { %539 = vrot.lane.b32.xlu2 %v516_v52, %s909_s8  ;;  %v518_v55 = vadd.f32 %v516_v52, %v250_v54  ;;  %v859_v52 = vld [vmem:[%s1206_s4 + $0x48] ss:$0 sm:$0xff] }
 0x970   :  { %v838_v56 = vmul.f32 -1.442695, %v518_v55 }
 0x972   :  { %885 = vpow2.f32 %v838_v56 }
 0x978   :  { %v886_v57 = vpop.eup %885 }
 0x979   :  { %v522_v58 = vadd.f32 1.0, %v886_v57 }
 0x97b   :  { %887 = vrcp.f32 %v522_v58  ;;  %v534_v63 = vand.u32 2147483648, %v522_v58  ;;  %vm528_vm7 = vweird.f32 %v522_v58  ;;  %v532_v0 = vand.u32 2147483647, %v522_v58 }
 0x97d   :  { %v535_v2 = vor.u32 1.1754944e-38, %v534_v63  ;;  %vm533_vm9 = vcmp.eq.f32.partialorder %v532_v0, 8.507059e+37 }
 0x981   :  { %v888_v59 = vpop.eup %887 }
 0x982   :  { %v524_v60 = vmul.f32 %v888_v59, %v522_v58  ;;  %vm529_vm6 = vweird.f32 %v888_v59  ;;  %v256_v58 = vadd.f32 %v992_v12, %v1092_v24 }
 0x983   :  { %vm530_vm8 = vmor %vm528_vm7, %vm529_vm6 }
 0x984   :  { %v525_v61 = vsub.f32 1.0, %v524_v60 }
 0x986   :  { %v526_v50 = vmul.f32 %v888_v59, %v525_v61 }
 0x988   :  { %v527_v62 = vadd.f32 %v888_v59, %v526_v50 }
 0x98a   :  { %v531_v1 = vsel %vm530_vm8, %v888_v59, %v527_v62 }
 0x98b   :  { %v536_v4 = vsel %vm533_vm9, %v535_v2, %v531_v1 }
 0x98c   :  { %v549_v10 = vsub.f32 1.0, %v536_v4  ;;  %v555_v14 = vmul.f32 %v536_v4, %v492_v47  ;;  %v756_v47 = vld [vmem:[%s1206_s4 + $0x38] sm:$0xff] }
 0x98d   :  { %799 = vmatpush.msra.mxu0 %v756_v47 }
 0x98f   :  { %800 = vmatpush.msra.mxu0 %v755_v48 }
 0x991   :  { %801 = vmatpush.msra.mxu0 %v754_v11 }
 0x993   :  { %802 = vmatpush.msra.mxu0 %v753_v49 }
 0x9c8   :  { %v540_v3 = vpop.permute.xlu2 %539 }
 0x9c9   :  { %v542_v5 = vmul.f32 %v540_v3, %v536_v4 }
 0x9cb   :  { %544 = vrot.lane.b32.xlu1 %v542_v5, %s909_s8 }
 0xa3d   :  { %v545_v7 = vpop.permute.xlu1 %544 }
 0xa3e   :  { %v547_v8 = vadd.f32 %v545_v7, %v250_v54  ;;  %v173_v54 = vadd.f32 %v859_v52, %v1122_v40  ;;  %v860_v52 = vld [vmem:[%s1206_s4 + $0x49] ss:$0 sm:$0xff] }
 0xa40   :  { %889 = vtanh.f32 %v547_v8  ;;  %v175_v55 = vmax.f32 %v173_v54, 0.0 }
 0xa46   :  { %v890_v9 = vpop.eup %889 }
 0xa47   :  { %551 = vrot.lane.b32.xlu0 %v890_v9, %s910_s17 }
 0xab9   :  { %v552_v13 = vpop.permute.xlu0 %551 }
 0xaba   :  { %v554_v15 = vmul.f32 %v552_v13, %v549_v10 }
 0xabc   :  { %v556_v39 = vadd.f32 %v555_v14, %v554_v15 }
 0xabe   :  { %558 = vrot.lane.b32.xlu1 %v556_v39, %s910_s17 }
 0xb30   :  { %v559_v41 = vpop.permute.xlu1 %558 }
 0xb31   :  { %839 = vmatmul.msk.f32.vlgmr.msrb.gmra.mxu3 %vm195_vm2, %v559_v41 }
 0xbb4   :  { %v579_v42 = vpop.f32.mrf.mxu3 }
 0xbb5   :  { %v580_v16 = vadd.f32 %v966_v6, %v579_v42 }
 0xbb7   :  { %603 = vrot.lane.b32.xlu1 %v580_v16, %s909_s8  ;;  %v582_v18 = vadd.f32 %v580_v16, %v253_v17 }
 0xbb9   :  { %v840_v19 = vmul.f32 -1.442695, %v582_v18 }
 0xbbb   :  { %891 = vpow2.f32 %v840_v19  ;;  %v259_v19 = vadd.f32 %v992_v12, %v1094_v25 }
 0xbc1   :  { %v892_v20 = vpop.eup %891 }
 0xbc2   :  { %v586_v21 = vadd.f32 1.0, %v892_v20 }
 0xbc4   :  { %893 = vrcp.f32 %v586_v21  ;;  %v598_v29 = vand.u32 2147483648, %v586_v21  ;;  %vm592_vm11 = vweird.f32 %v586_v21  ;;  %v596_v30 = vand.u32 2147483647, %v586_v21 }
 0xbc6   :  { %v599_v32 = vor.u32 1.1754944e-38, %v598_v29  ;;  %vm597_vm13 = vcmp.eq.f32.partialorder %v596_v30, 8.507059e+37 }
 0xbca   :  { %v894_v22 = vpop.eup %893 }
 0xbcb   :  { %v588_v23 = vmul.f32 %v894_v22, %v586_v21  ;;  %vm593_vm10 = vweird.f32 %v894_v22 }
 0xbcc   :  { %vm594_vm12 = vmor %vm592_vm11, %vm593_vm10 }
 0xbcd   :  { %v589_v26 = vsub.f32 1.0, %v588_v23 }
 0xbcf   :  { %v590_v27 = vmul.f32 %v894_v22, %v589_v26 }
 0xbd1   :  { %v591_v28 = vadd.f32 %v894_v22, %v590_v27 }
 0xbd3   :  { %v595_v31 = vsel %vm594_vm12, %v894_v22, %v591_v28 }
 0xbd4   :  { %v600_v33 = vsel %vm597_vm13, %v599_v32, %v595_v31 }
 0xbd5   :  { %v613_v38 = vsub.f32 1.0, %v600_v33  ;;  %v619_v44 = vmul.f32 %v600_v33, %v556_v39 }
 0xc29   :  { %v604_v51 = vpop.permute.xlu1 %603 }
 0xc2a   :  { %v606_v34 = vmul.f32 %v604_v51, %v600_v33 }
 0xc2c   :  { %608 = vrot.lane.b32.xlu2 %v606_v34, %s909_s8 }
 0xc86   :  { %v609_v35 = vpop.permute.xlu2 %608 }
 0xc87   :  { %v611_v36 = vadd.f32 %v609_v35, %v253_v17 }
 0xc89   :  { %895 = vtanh.f32 %v611_v36 }
 0xc8f   :  { %v896_v37 = vpop.eup %895 }
 0xc90   :  { %615 = vrot.lane.b32.xlu0 %v896_v37, %s910_s17  ;;  %v752_v37 = vld [vmem:[%s1206_s4 + $0x18] sm:$0xff] }
 0xc91   :  { %776 = vmatpush.msra.mxu3 %v752_v37 }
 0xd02   :  { %v616_v43 = vpop.permute.xlu0 %615 }
 0xd03   :  { %v618_v45 = vmul.f32 %v616_v43, %v613_v38  ;;  %v751_v38 = vld [vmem:[%s1206_s4 + $0x10] sm:$0xff]  ;;  %v750_v43 = vld [vmem:[%s1206_s4 + $0x8] sm:$0xff] }
 0xd04   :  { %777 = vmatpush.msra.mxu3 %v751_v38 }
 0xd05   :  { %v620_v46 = vadd.f32 %v619_v44, %v618_v45  ;;  %v749_v44 = vld [vmem:[%s1206_s4] sm:$0xff] }
 0xd06   :  { %778 = vmatpush.msra.mxu3 %v750_v43 }
 0xd07   :  { %622 = vrot.lane.b32.xlu1 %v620_v46, %s910_s17 }
 0xd08   :  { %779 = vmatpush.msra.mxu3 %v749_v44 }
 0xd79   :  { %v623_v53 = vpop.permute.xlu1 %622 }
 0xd7a   :  { %841 = vmatmul.msk.f32.vlgmr.msrb.gmra.mxu0 %vm195_vm2, %v623_v53 }
 0xd82   :  { %846 = vmatmul.msk.f32.vlgmr.msra.gmra.mxu0 %vm195_vm2, %v175_v55 }
 0xdf7   :  { %v643_v56 = vpop.f32.mrf.mxu0 }
 0xdf8   :  { %v644_v57 = vadd.f32 %v966_v6, %v643_v56 }
 0xdfa   :  { %667 = vrot.lane.b32.xlu2 %v644_v57, %s909_s8  ;;  %v646_v59 = vadd.f32 %v644_v57, %v256_v58 }
 0xdfc   :  { %v842_v60 = vmul.f32 -1.442695, %v646_v59 }
 0xdfe   :  { %897 = vpow2.f32 %v842_v60 }
 0xdff   :  { %v804_v55 = vpop.f32.mrf.mxu0 }
 0xe04   :  { %v898_v61 = vpop.eup %897 }
 0xe05   :  { %v650_v50 = vadd.f32 1.0, %v898_v61 }
 0xe07   :  { %899 = vrcp.f32 %v650_v50  ;;  %v662_v2 = vand.u32 2147483648, %v650_v50  ;;  %vm656_vm15 = vweird.f32 %v650_v50  ;;  %v660_v3 = vand.u32 2147483647, %v650_v50 }
 0xe09   :  { %v663_v5 = vor.u32 1.1754944e-38, %v662_v2  ;;  %vm661_vm0 = vcmp.eq.f32.partialorder %v660_v3, 8.507059e+37 }
 0xe0d   :  { %v900_v62 = vpop.eup %899 }
 0xe0e   :  { %v652_v63 = vmul.f32 %v900_v62, %v650_v50  ;;  %vm657_vm14 = vweird.f32 %v900_v62 }
 0xe0f   :  { %vm658_vm1 = vmor %vm656_vm15, %vm657_vm14 }
 0xe10   :  { %v653_v40 = vsub.f32 1.0, %v652_v63 }
 0xe12   :  { %v654_v0 = vmul.f32 %v900_v62, %v653_v40 }
 0xe14   :  { %v655_v1 = vadd.f32 %v900_v62, %v654_v0 }
 0xe16   :  { %v659_v4 = vsel %vm658_vm1, %v900_v62, %v655_v1 }
 0xe17   :  { %v664_v7 = vsel %vm661_vm0, %v663_v5, %v659_v4 }
 0xe18   :  { %v677_v14 = vsub.f32 1.0, %v664_v7  ;;  %v683_v39 = vmul.f32 %v664_v7, %v620_v46 }
 0xe54   :  { %v668_v24 = vpop.permute.xlu2 %667 }
 0xe55   :  { %v670_v8 = vmul.f32 %v668_v24, %v664_v7 }
 0xe57   :  { %672 = vrot.lane.b32.xlu0 %v670_v8, %s909_s8 }
 0xec9   :  { %v673_v9 = vpop.permute.xlu0 %672 }
 0xeca   :  { %v675_v10 = vadd.f32 %v673_v9, %v256_v58 }
 0xecc   :  { %901 = vtanh.f32 %v675_v10 }
 0xed2   :  { %v902_v13 = vpop.eup %901 }
 0xed3   :  { %679 = vrot.lane.b32.xlu1 %v902_v13, %s910_s17 }
 0xf45   :  { %v680_v15 = vpop.permute.xlu1 %679 }
 0xf46   :  { %v682_v41 = vmul.f32 %v680_v15, %v677_v14 }
 0xf48   :  { %v684_v42 = vadd.f32 %v683_v39, %v682_v41 }
 0xf4a   :  { %686 = vrot.lane.b32.xlu2 %v684_v42, %s910_s17 }
 0xfa4   :  { %v687_v16 = vpop.permute.xlu2 %686 }
 0xfa5   :  { %843 = vmatmul.msk.f32.vlgmr.msra.gmra.mxu2 %vm195_vm2, %v687_v16 }
0x1028   :  { %v707_v17 = vpop.f32.mrf.mxu2 }
0x1029   :  { %v708_v18 = vadd.f32 %v966_v6, %v707_v17 }
0x102b   :  { %731 = vrot.lane.b32.xlu0 %v708_v18, %s909_s8  ;;  %v710_v20 = vadd.f32 %v708_v18, %v259_v19 }
0x102d   :  { %v844_v21 = vmul.f32 -1.442695, %v710_v20 }
0x102f   :  { %903 = vpow2.f32 %v844_v21 }
0x1035   :  { %v904_v22 = vpop.eup %903 }
0x1036   :  { %v714_v23 = vadd.f32 1.0, %v904_v22 }
0x1038   :  { %905 = vrcp.f32 %v714_v23  ;;  %v726_v31 = vand.u32 2147483648, %v714_v23  ;;  %vm720_vm4 = vweird.f32 %v714_v23  ;;  %v724_v6 = vand.u32 2147483647, %v714_v23 }
0x103a   :  { %v727_v51 = vor.u32 1.1754944e-38, %v726_v31  ;;  %vm725_vm6 = vcmp.eq.f32.partialorder %v724_v6, 8.507059e+37 }
0x103e   :  { %v906_v26 = vpop.eup %905 }
0x103f   :  { %v716_v27 = vmul.f32 %v906_v26, %v714_v23  ;;  %vm721_vm3 = vweird.f32 %v906_v26 }
0x1040   :  { %vm722_vm5 = vmor %vm720_vm4, %vm721_vm3 }
0x1041   :  { %v717_v28 = vsub.f32 1.0, %v716_v27 }
0x1043   :  { %v718_v29 = vmul.f32 %v906_v26, %v717_v28 }
0x1045   :  { %v719_v30 = vadd.f32 %v906_v26, %v718_v29 }
0x1047   :  { %v723_v32 = vsel %vm722_vm5, %v906_v26, %v719_v30 }
0x1048   :  { %v728_v25 = vsel %vm725_vm6, %v727_v51, %v723_v32 }
0x1049   :  { %v741_v45 = vsub.f32 1.0, %v728_v25  ;;  %v747_v47 = vmul.f32 %v728_v25, %v684_v42 }
0x109d   :  { %v732_v12 = vpop.permute.xlu0 %731 }
0x109e   :  { %v734_v33 = vmul.f32 %v732_v12, %v728_v25 }
0x10a0   :  { %736 = vrot.lane.b32.xlu1 %v734_v33, %s909_s8 }
0x1112   :  { %v737_v34 = vpop.permute.xlu1 %736 }
0x1113   :  { %v739_v35 = vadd.f32 %v737_v34, %v259_v19 }
0x1115   :  { %907 = vtanh.f32 %v739_v35 }
0x111b   :  { %v908_v36 = vpop.eup %907 }
0x111c   :  { %743 = vrot.lane.b32.xlu2 %v908_v36, %s910_s17 }
0x1176   :  { %v744_v46 = vpop.permute.xlu2 %743 }
0x1177   :  { %v746_v48 = vmul.f32 %v744_v46, %v741_v45 }
0x1179   :  { %v748_v11 = vadd.f32 %v747_v47, %v746_v48 }
0x117b   :  { %760 = vrot.lane.b32.xlu0 %v748_v11, %s910_s17 }
0x11ed   :  { %v761_v49 = vpop.permute.xlu0 %760 }
0x11ee   :  { %845 = vmatmul.msk.f32.vlgmr.msra.gmra.mxu3 %vm195_vm2, %v761_v49 }
0x1271   :  { %v781_v53 = vpop.f32.mrf.mxu3 }
0x1272   :  { %v782_v54 = vadd.f32 %v860_v52, %v781_v53 }
0x1274   :  { %v807_v56 = vadd.f32 %v804_v55, %v782_v54 }
0x1276   :  { %808 = vst.msk [vmem:[%s1207_s5] sm:$0xff] %vm195_vm2, %v807_v56 }

</bundles_post_ra>
